<compile_context>
chip_gen: v5e
topology: v5e:2x2
jax: 0.10.0
libtpu: 0.0.40
codegen_flags: <defaults>
</compile_context>

<pallas_src>
import functools

import jax
import jax.numpy as jnp
import numpy as np
from jax.experimental import pallas as pl
from jax.experimental.pallas import tpu as pltpu

NUM_HEADS = 2
DIM_QK = 10
DIM_V = 10
DROPOUT_P = 0.1
SCALE_FACTOR = 1.0


# ------------------------------ fused kernel -------------------------------
#
# Row layout: the leading dims of query/key/value (B, S, H) are flattened
# row-major, r = b*S*H + s*H + h, with H == 2.  The attention "sequence" axis
# of the torch model is H, so every row only ever interacts with its pair
# partner r ^ 1 — that lets the whole softmax/attention stay 2-D (rows x
# lanes) on the VPU, no in-kernel reshapes or tiny batched matmuls.


def _fused_sdpa_kernel(x_ref, w_ref, b_ref, perm_ref, u_ref, o_ref, *,
                       num_heads, d_qk, d_v, scale, dropout_p):
    # One MXU push for all three projections (block-diagonal fused weight).
    #   x: (N, 2*d_qk + d_v), w: (2*d_qk + d_v, 2*nH*d_qk + nH*d_v)
    y = (jnp.dot(x_ref[...], w_ref[...], preferred_element_type=jnp.float32)
         + b_ref[...])

    k_off = num_heads * d_qk
    v_off = 2 * num_heads * d_qk

    # Row-partner swap (rows 2m <-> 2m+1) of the projected [K | V] block via a
    # constant permutation matrix: one tiny extra MXU push, no relayouts.
    kv_sw = jnp.dot(perm_ref[...], y[:, k_off:],
                    preferred_element_type=jnp.float32)

    u = u_ref[...]  # (N, 2*num_heads) dropout uniforms
    inv_keep = 1.0 / (1.0 - dropout_p) if dropout_p > 0.0 else 1.0

    outs = []
    for c in range(num_heads):  # unrolled over the torch chunk index
        q_c = y[:, c * d_qk:(c + 1) * d_qk]
        k_c = y[:, k_off + c * d_qk:k_off + (c + 1) * d_qk]
        v_c = y[:, v_off + c * d_v:v_off + (c + 1) * d_v]
        k_sw = kv_sw[:, c * d_qk:(c + 1) * d_qk]
        v_sw = kv_sw[:, num_heads * d_qk + c * d_v:
                     num_heads * d_qk + (c + 1) * d_v]

        # scores: each row against itself (j == i) and its partner (j != i)
        s_same = jnp.sum(q_c * k_c, axis=-1, keepdims=True) * scale
        s_cross = jnp.sum(q_c * k_sw, axis=-1, keepdims=True) * scale

        # 2-way softmax over {same, cross}
        m = jnp.maximum(s_same, s_cross)
        e_same = jnp.exp(s_same - m)
        e_cross = jnp.exp(s_cross - m)
        inv_denom = 1.0 / (e_same + e_cross)
        p_same = e_same * inv_denom
        p_cross = e_cross * inv_denom

        if dropout_p > 0.0:
            u_same = u[:, 2 * c:2 * c + 1]
            u_cross = u[:, 2 * c + 1:2 * c + 2]
            p_same = jnp.where(u_same >= dropout_p, p_same * inv_keep, 0.0)
            p_cross = jnp.where(u_cross >= dropout_p, p_cross * inv_keep, 0.0)

        # output = p @ v, expanded over the two keys of each pair (pure VPU)
        outs.append(p_same * v_c + p_cross * v_sw)

    # single lane-dense store: (N, num_heads * d_v)
    o_ref[...] = jnp.concatenate(outs, axis=-1)


def _fused_sdpa(x, w, b, perm, u, *, num_heads, d_qk, d_v, scale, dropout_p):
    n = x.shape[0]
    kernel = functools.partial(
        _fused_sdpa_kernel, num_heads=num_heads, d_qk=d_qk, d_v=d_v,
        scale=scale, dropout_p=dropout_p)
    return pl.pallas_call(
        kernel,
        out_shape=jax.ShapeDtypeStruct((n, num_heads * d_v), jnp.float32),
        in_specs=[pl.BlockSpec(memory_space=pltpu.MemorySpace.VMEM)] * 5,
        out_specs=pl.BlockSpec(memory_space=pltpu.MemorySpace.VMEM),
    )(x, w, b, perm, u)


# --------------------------- parameters & wrapper ---------------------------


def init_params(key):
    """nn.Linear-style init + pre-fused block-diagonal weight/bias."""

    def linear_init(k, fan_in, fan_out):
        k1, k2 = jax.random.split(k)
        bound = 1.0 / (fan_in ** 0.5)
        w = jax.random.uniform(k1, (fan_out, fan_in), jnp.float32, -bound, bound)
        b = jax.random.uniform(k2, (fan_out,), jnp.float32, -bound, bound)
        return w, b

    kq, kk, kv = jax.random.split(key, 3)
    wq, bq = linear_init(kq, DIM_QK, NUM_HEADS * DIM_QK)
    wk, bk = linear_init(kk, DIM_QK, NUM_HEADS * DIM_QK)
    wv, bv = linear_init(kv, DIM_V, NUM_HEADS * DIM_V)

    din = 2 * DIM_QK + DIM_V
    dout = 2 * NUM_HEADS * DIM_QK + NUM_HEADS * DIM_V
    w_fused = jnp.zeros((din, dout), jnp.float32)
    w_fused = w_fused.at[0:DIM_QK, 0:NUM_HEADS * DIM_QK].set(wq.T)
    w_fused = w_fused.at[DIM_QK:2 * DIM_QK,
                         NUM_HEADS * DIM_QK:2 * NUM_HEADS * DIM_QK].set(wk.T)
    w_fused = w_fused.at[2 * DIM_QK:2 * DIM_QK + DIM_V,
                         2 * NUM_HEADS * DIM_QK:].set(wv.T)
    b_fused = jnp.concatenate([bq, bk, bv]).reshape(1, dout)

    return dict(wq=wq, bq=bq, wk=wk, bk=bk, wv=wv, bv=bv,
                w_fused=w_fused, b_fused=b_fused)


def model_forward(params, query, key, value, dropout_rng):
    B, S, H, d_qk = query.shape
    d_v = value.shape[-1]
    assert H == 2, "pair-swap attention formulation assumes seq dim == 2"
    n = B * S * H

    # [query | key | value] concatenated on lanes -> one projection matmul
    x = jnp.concatenate(
        [query.reshape(n, d_qk), key.reshape(n, d_qk), value.reshape(n, d_v)],
        axis=-1)

    # constant even/odd row-partner permutation (folded/cached by XLA)
    perm = jax.nn.one_hot(jnp.arange(n) ^ 1, n, dtype=jnp.float32)

    # dropout uniforms: one per (row, chunk, {same, cross}) softmax element
    # TODO(synk): torch's exact dropout RNG stream is not reproduced; only the
    # Bernoulli(1-p) + 1/(1-p) scaling semantics are.
    u = jax.random.uniform(dropout_rng, (n, 2 * NUM_HEADS), jnp.float32)

    out = _fused_sdpa(x, params["w_fused"], params["b_fused"], perm, u,
                      num_heads=NUM_HEADS, d_qk=d_qk, d_v=d_v,
                      scale=SCALE_FACTOR, dropout_p=DROPOUT_P)  # (n, nH*d_v)

    # back to torch layout: (num_heads*B, S, H, d_v), chunks stacked on dim 0
    out = out.reshape(B, S, H, NUM_HEADS, d_v)
    out = jnp.transpose(out, (3, 0, 1, 2, 4)).reshape(NUM_HEADS * B, S, H, d_v)
    return out


# ------------------------ pure-JAX reference (check) ------------------------


def reference_forward(params, query, key, value, dropout_rng):
    B, S, H, d_qk = query.shape
    d_v = value.shape[-1]
    nH = NUM_HEADS
    n = B * S * H

    def lin(x, w, b):
        return jnp.einsum("...i,oi->...o", x, w) + b

    qp = lin(query, params["wq"], params["bq"])
    kp = lin(key, params["wk"], params["bk"])
    vp = lin(value, params["wv"], params["bv"])

    def chunk_cat(x, d):
        return jnp.concatenate([x[..., c * d:(c + 1) * d] for c in range(nH)],
                               axis=0)

    qc = chunk_cat(qp, d_qk)
    kc = chunk_cat(kp, d_qk)
    vc = chunk_cat(vp, d_v)

    s = jnp.einsum("...id,...jd->...ij", qc, kc) * SCALE_FACTOR
    p = jax.nn.softmax(s, axis=-1)

    # same dropout uniforms as the kernel, remapped to (nH*B, S, H, H)
    u = jax.random.uniform(dropout_rng, (n, 2 * nH), jnp.float32)
    keep = u >= DROPOUT_P
    c_i = jnp.arange(nH)[:, None, None, None, None]
    b_i = jnp.arange(B)[None, :, None, None, None]
    s_i = jnp.arange(S)[None, None, :, None, None]
    i_i = jnp.arange(H)[None, None, None, :, None]
    j_i = jnp.arange(H)[None, None, None, None, :]
    rows = b_i * (S * H) + s_i * H + i_i
    cols = 2 * c_i + (i_i ^ j_i)
    keep_mask = keep[rows, cols].reshape(nH * B, S, H, H)

    p = jnp.where(keep_mask, p / (1.0 - DROPOUT_P), 0.0)
    return jnp.einsum("...ij,...jd->...id", p, vc)


if __name__ == "__main__":
    root = jax.random.PRNGKey(0)
    kparam, kq, kk, kv, kdrop = jax.random.split(root, 5)

    params = init_params(kparam)
    query = jax.random.normal(kq, (4, 2, NUM_HEADS, DIM_QK), jnp.float32)
    key_in = jax.random.normal(kk, (4, 2, NUM_HEADS, DIM_QK), jnp.float32)
    value = jax.random.normal(kv, (4, 2, NUM_HEADS, DIM_V), jnp.float32)

    out = model_forward(params, query, key_in, value, kdrop)
    out = jax.block_until_ready(out)

    assert out.shape == (NUM_HEADS * 4, 2, NUM_HEADS, DIM_V), out.shape
    assert out.dtype == jnp.float32

    ref = reference_forward(params, query, key_in, value, kdrop)
    np.testing.assert_allclose(np.asarray(out), np.asarray(ref),
                               rtol=1e-1, atol=1e-1)

    print("KERNEL_OK")
</pallas_src>

<mosaic_0001>
module attributes {stable_mosaic.version = 11 : i64} {
  func.func @_fused_sdpa_kernel(%arg0: memref<16x30xf32, #tpu.memory_space<vmem>>, %arg1: memref<30x60xf32, #tpu.memory_space<vmem>>, %arg2: memref<1x60xf32, #tpu.memory_space<vmem>>, %arg3: memref<16x16xf32, #tpu.memory_space<vmem>>, %arg4: memref<16x4xf32, #tpu.memory_space<vmem>>, %arg5: memref<16x20xf32, #tpu.memory_space<vmem>>) attributes {dimension_semantics = [], scalar_prefetch = 0 : i64, scratch_operands = 0 : i64, tpu.core_type = #tpu.core_type<tc>} {
    %c0 = arith.constant 0 : index
    %c0_0 = arith.constant 0 : index
    %0 = vector.load %arg0[%c0, %c0_0] : memref<16x30xf32, #tpu.memory_space<vmem>>, vector<16x30xf32>
    %c0_1 = arith.constant 0 : index
    %c0_2 = arith.constant 0 : index
    %1 = vector.load %arg1[%c0_1, %c0_2] : memref<30x60xf32, #tpu.memory_space<vmem>>, vector<30x60xf32>
    %cst = arith.constant dense<0.000000e+00> : vector<16x60xf32>
    %2 = tpu.matmul %0, %1, %cst {dimension_numbers = #tpu.dot_dimension_numbers<[1], [0], [0], [1], [0, 0, 1, 1], [], []>} : vector<16x30xf32>, vector<30x60xf32>, vector<16x60xf32> -> vector<16x60xf32>
    %c0_3 = arith.constant 0 : index
    %c0_4 = arith.constant 0 : index
    %3 = vector.load %arg2[%c0_3, %c0_4] : memref<1x60xf32, #tpu.memory_space<vmem>>, vector<1x60xf32>
    %4 = vector.broadcast %3 : vector<1x60xf32> to vector<16x60xf32>
    %5 = arith.addf %2, %4 : vector<16x60xf32>
    %c0_5 = arith.constant 0 : index
    %c0_6 = arith.constant 0 : index
    %6 = vector.load %arg3[%c0_5, %c0_6] : memref<16x16xf32, #tpu.memory_space<vmem>>, vector<16x16xf32>
    %7 = vector.extract_strided_slice %5 {offsets = [0, 20], sizes = [16, 40], strides = [1, 1]} : vector<16x60xf32> to vector<16x40xf32>
    %cst_7 = arith.constant dense<0.000000e+00> : vector<16x40xf32>
    %8 = tpu.matmul %6, %7, %cst_7 {dimension_numbers = #tpu.dot_dimension_numbers<[1], [0], [0], [1], [0, 0, 1, 1], [], []>} : vector<16x16xf32>, vector<16x40xf32>, vector<16x40xf32> -> vector<16x40xf32>
    %c0_8 = arith.constant 0 : index
    %c0_9 = arith.constant 0 : index
    %9 = vector.load %arg4[%c0_8, %c0_9] : memref<16x4xf32, #tpu.memory_space<vmem>>, vector<16x4xf32>
    %10 = vector.extract_strided_slice %5 {offsets = [0, 0], sizes = [16, 10], strides = [1, 1]} : vector<16x60xf32> to vector<16x10xf32>
    %11 = vector.extract_strided_slice %5 {offsets = [0, 20], sizes = [16, 10], strides = [1, 1]} : vector<16x60xf32> to vector<16x10xf32>
    %12 = vector.extract_strided_slice %5 {offsets = [0, 40], sizes = [16, 10], strides = [1, 1]} : vector<16x60xf32> to vector<16x10xf32>
    %13 = vector.extract_strided_slice %8 {offsets = [0, 0], sizes = [16, 10], strides = [1, 1]} : vector<16x40xf32> to vector<16x10xf32>
    %14 = vector.extract_strided_slice %8 {offsets = [0, 20], sizes = [16, 10], strides = [1, 1]} : vector<16x40xf32> to vector<16x10xf32>
    %15 = arith.mulf %10, %11 : vector<16x10xf32>
    %cst_10 = arith.constant dense<0.000000e+00> : vector<16xf32>
    %16 = vector.multi_reduction <add>, %15, %cst_10 [1] : vector<16x10xf32> to vector<16xf32>
    %17 = vector.shape_cast %16 : vector<16xf32> to vector<16x1xf32>
    %cst_11 = arith.constant 1.000000e+00 : f32
    %18 = vector.broadcast %cst_11 : f32 to vector<16x1xf32>
    %19 = arith.mulf %17, %18 : vector<16x1xf32>
    %20 = arith.mulf %10, %13 : vector<16x10xf32>
    %cst_12 = arith.constant dense<0.000000e+00> : vector<16xf32>
    %21 = vector.multi_reduction <add>, %20, %cst_12 [1] : vector<16x10xf32> to vector<16xf32>
    %22 = vector.shape_cast %21 : vector<16xf32> to vector<16x1xf32>
    %cst_13 = arith.constant 1.000000e+00 : f32
    %23 = vector.broadcast %cst_13 : f32 to vector<16x1xf32>
    %24 = arith.mulf %22, %23 : vector<16x1xf32>
    %25 = arith.maximumf %19, %24 : vector<16x1xf32>
    %26 = arith.subf %19, %25 : vector<16x1xf32>
    %27 = math.exp %26 : vector<16x1xf32>
    %28 = arith.subf %24, %25 : vector<16x1xf32>
    %29 = math.exp %28 : vector<16x1xf32>
    %30 = arith.addf %27, %29 : vector<16x1xf32>
    %cst_14 = arith.constant 1.000000e+00 : f32
    %31 = vector.broadcast %cst_14 : f32 to vector<16x1xf32>
    %32 = arith.divf %31, %30 : vector<16x1xf32>
    %33 = arith.mulf %27, %32 : vector<16x1xf32>
    %34 = arith.mulf %29, %32 : vector<16x1xf32>
    %35 = vector.extract_strided_slice %9 {offsets = [0, 0], sizes = [16, 1], strides = [1, 1]} : vector<16x4xf32> to vector<16x1xf32>
    %36 = vector.extract_strided_slice %9 {offsets = [0, 1], sizes = [16, 1], strides = [1, 1]} : vector<16x4xf32> to vector<16x1xf32>
    %cst_15 = arith.constant 1.000000e-01 : f32
    %37 = vector.broadcast %cst_15 : f32 to vector<16x1xf32>
    %38 = arith.cmpf oge, %35, %37 : vector<16x1xf32>
    %cst_16 = arith.constant 1.11111116 : f32
    %39 = vector.broadcast %cst_16 : f32 to vector<16x1xf32>
    %40 = arith.mulf %33, %39 : vector<16x1xf32>
    %cst_17 = arith.constant 0.000000e+00 : f32
    %41 = vector.broadcast %cst_17 : f32 to vector<16x1xf32>
    %42 = arith.select %38, %40, %41 : vector<16x1xi1>, vector<16x1xf32>
    %cst_18 = arith.constant 1.000000e-01 : f32
    %43 = vector.broadcast %cst_18 : f32 to vector<16x1xf32>
    %44 = arith.cmpf oge, %36, %43 : vector<16x1xf32>
    %cst_19 = arith.constant 1.11111116 : f32
    %45 = vector.broadcast %cst_19 : f32 to vector<16x1xf32>
    %46 = arith.mulf %34, %45 : vector<16x1xf32>
    %cst_20 = arith.constant 0.000000e+00 : f32
    %47 = vector.broadcast %cst_20 : f32 to vector<16x1xf32>
    %48 = arith.select %44, %46, %47 : vector<16x1xi1>, vector<16x1xf32>
    %49 = vector.broadcast %42 : vector<16x1xf32> to vector<16x10xf32>
    %50 = arith.mulf %49, %12 : vector<16x10xf32>
    %51 = vector.broadcast %48 : vector<16x1xf32> to vector<16x10xf32>
    %52 = arith.mulf %51, %14 : vector<16x10xf32>
    %53 = arith.addf %50, %52 : vector<16x10xf32>
    %54 = vector.extract_strided_slice %5 {offsets = [0, 10], sizes = [16, 10], strides = [1, 1]} : vector<16x60xf32> to vector<16x10xf32>
    %55 = vector.extract_strided_slice %5 {offsets = [0, 30], sizes = [16, 10], strides = [1, 1]} : vector<16x60xf32> to vector<16x10xf32>
    %56 = vector.extract_strided_slice %5 {offsets = [0, 50], sizes = [16, 10], strides = [1, 1]} : vector<16x60xf32> to vector<16x10xf32>
    %57 = vector.extract_strided_slice %8 {offsets = [0, 10], sizes = [16, 10], strides = [1, 1]} : vector<16x40xf32> to vector<16x10xf32>
    %58 = vector.extract_strided_slice %8 {offsets = [0, 30], sizes = [16, 10], strides = [1, 1]} : vector<16x40xf32> to vector<16x10xf32>
    %59 = arith.mulf %54, %55 : vector<16x10xf32>
    %cst_21 = arith.constant dense<0.000000e+00> : vector<16xf32>
    %60 = vector.multi_reduction <add>, %59, %cst_21 [1] : vector<16x10xf32> to vector<16xf32>
    %61 = vector.shape_cast %60 : vector<16xf32> to vector<16x1xf32>
    %cst_22 = arith.constant 1.000000e+00 : f32
    %62 = vector.broadcast %cst_22 : f32 to vector<16x1xf32>
    %63 = arith.mulf %61, %62 : vector<16x1xf32>
    %64 = arith.mulf %54, %57 : vector<16x10xf32>
    %cst_23 = arith.constant dense<0.000000e+00> : vector<16xf32>
    %65 = vector.multi_reduction <add>, %64, %cst_23 [1] : vector<16x10xf32> to vector<16xf32>
    %66 = vector.shape_cast %65 : vector<16xf32> to vector<16x1xf32>
    %cst_24 = arith.constant 1.000000e+00 : f32
    %67 = vector.broadcast %cst_24 : f32 to vector<16x1xf32>
    %68 = arith.mulf %66, %67 : vector<16x1xf32>
    %69 = arith.maximumf %63, %68 : vector<16x1xf32>
    %70 = arith.subf %63, %69 : vector<16x1xf32>
    %71 = math.exp %70 : vector<16x1xf32>
    %72 = arith.subf %68, %69 : vector<16x1xf32>
    %73 = math.exp %72 : vector<16x1xf32>
    %74 = arith.addf %71, %73 : vector<16x1xf32>
    %cst_25 = arith.constant 1.000000e+00 : f32
    %75 = vector.broadcast %cst_25 : f32 to vector<16x1xf32>
    %76 = arith.divf %75, %74 : vector<16x1xf32>
    %77 = arith.mulf %71, %76 : vector<16x1xf32>
    %78 = arith.mulf %73, %76 : vector<16x1xf32>
    %79 = vector.extract_strided_slice %9 {offsets = [0, 2], sizes = [16, 1], strides = [1, 1]} : vector<16x4xf32> to vector<16x1xf32>
    %80 = vector.extract_strided_slice %9 {offsets = [0, 3], sizes = [16, 1], strides = [1, 1]} : vector<16x4xf32> to vector<16x1xf32>
    %cst_26 = arith.constant 1.000000e-01 : f32
    %81 = vector.broadcast %cst_26 : f32 to vector<16x1xf32>
    %82 = arith.cmpf oge, %79, %81 : vector<16x1xf32>
    %cst_27 = arith.constant 1.11111116 : f32
    %83 = vector.broadcast %cst_27 : f32 to vector<16x1xf32>
    %84 = arith.mulf %77, %83 : vector<16x1xf32>
    %cst_28 = arith.constant 0.000000e+00 : f32
    %85 = vector.broadcast %cst_28 : f32 to vector<16x1xf32>
    %86 = arith.select %82, %84, %85 : vector<16x1xi1>, vector<16x1xf32>
    %cst_29 = arith.constant 1.000000e-01 : f32
    %87 = vector.broadcast %cst_29 : f32 to vector<16x1xf32>
    %88 = arith.cmpf oge, %80, %87 : vector<16x1xf32>
    %cst_30 = arith.constant 1.11111116 : f32
    %89 = vector.broadcast %cst_30 : f32 to vector<16x1xf32>
    %90 = arith.mulf %78, %89 : vector<16x1xf32>
    %cst_31 = arith.constant 0.000000e+00 : f32
    %91 = vector.broadcast %cst_31 : f32 to vector<16x1xf32>
    %92 = arith.select %88, %90, %91 : vector<16x1xi1>, vector<16x1xf32>
    %93 = vector.broadcast %86 : vector<16x1xf32> to vector<16x10xf32>
    %94 = arith.mulf %93, %56 : vector<16x10xf32>
    %95 = vector.broadcast %92 : vector<16x1xf32> to vector<16x10xf32>
    %96 = arith.mulf %95, %58 : vector<16x10xf32>
    %97 = arith.addf %94, %96 : vector<16x10xf32>
    %98 = tpu.concatenate %53, %97 in 1 : vector<16x10xf32>, vector<16x10xf32> -> vector<16x20xf32>
    %c0_32 = arith.constant 0 : index
    %c0_33 = arith.constant 0 : index
    %99 = vector.load %arg5[%c0_32, %c0_33] : memref<16x20xf32, #tpu.memory_space<vmem>>, vector<16x20xf32>
    tpu.vector_store %arg5[%c0_32, %c0_33], %98 {strides = array<i32>} : memref<16x20xf32, #tpu.memory_space<vmem>>, vector<16x20xf32>,
    return
  }
}

</mosaic_0001>

<bundles_post_ra>
// kernel: tpu_custom_call.1
= control target key start
LH: loop header
LB: loop body
LE: loop exit
PB: predicated region body
PF: predicated region fallthrough
CT: control target
= control target key end

     0   :  { %10 = vsyncpa [#allocation3], 0  ;;  %s686_s0 = inlined_call_operand.vmem [shape: f32[16,30], index: 0, kind: input, shape index: {}]   ;;  %s687_s1 = inlined_call_operand.hbm [shape: f32[30,60], index: 1, kind: input, shape index: {}]   ;;  %s688_s2 = inlined_call_operand.vmem [shape: f32[1,60], index: 2, kind: input, shape index: {}]   ;;  %s689_s3 = inlined_call_operand.hbm [shape: f32[16,16], index: 3, kind: input, shape index: {}]   ;;  %s690_s4 = inlined_call_operand.vmem [shape: f32[16,4], index: 4, kind: input, shape index: {}]   ;;  %s691_s5 = inlined_call_operand.hbm [shape: f32[16,20], index: 5, kind: output, shape index: {}]  }
   0x1   :  { %11 = vsyncpa [#allocation6], 0 }
   0x2   :  { %12 = vsyncpa [#allocation4], 0  ;;  %s19_s20 = sshll.u32 %s687_s1, 4  ;;  %s546_s21 = smov [#allocation2]   ;;  %s20_s20 = int_to_ptr.hbm [resolvable:$true] %s19_s20 }
   0x3   :  { %s21_s22 = sshll.u32 %s546_s21, 4  ;;  %s34_s25 = sshll.u32 %s689_s3, 4  ;;  %s22_s22 = int_to_ptr.vmem [resolvable:$true] %s21_s22  ;;  %s35_s25 = int_to_ptr.hbm [resolvable:$true] %s34_s25 }
   0x4   :  { %s547_s26 = smov 128   ;;  %s548_s27 = smov 8  }
   0x5   :  { %27 = dma.hbm_to_vmem [thread:$0]  %s20_s20, 512, %s22_s22, [#allocation3], %s547_s26, %s547_s26, %s548_s27  }
   0x6   :  { %s549_s28 = smov [#allocation5]  }
   0x7   :  { %s36_s29 = sshll.u32 %s549_s28, 4  ;;  %s37_s29 = int_to_ptr.vmem [resolvable:$true] %s36_s29 }
   0x8   :  { %42 = dma.hbm_to_vmem [thread:$0]  %s35_s25, 256, %s37_s29, [#allocation6], %s547_s26, %s547_s26, %s548_s27  }
   0x9   :  { %540 = dma.done.wait [#allocation3], 512  }
   0xa   :  { %541 = vsyncadd [#allocation3], 4294966784 }
   0xb   :  { %542 = dma.done.wait [#allocation6], 256  }
   0xc   :  { %543 = vsyncadd [#allocation6], 4294967040  ;;  %vm70_vm0 = vcmask 1045504   ;;  %v58_v0 = vld [vmem:[#allocation2 + $0x18] sm:$0x3f]  ;;  %v57_v1 = vld [vmem:[#allocation2 + $0x10] sm:$0xff] }
   0xd   :  { %416 = vmatpush.msk.msra.mxu2 %vm70_vm0, %v58_v0  ;;  %411 = vmatpush.msk.msra.mxu0 %vm70_vm0, %v58_v0  ;;  %v56_v2 = vld [vmem:[#allocation2 + $0x8] sm:$0xff]  ;;  %v55_v3 = vld [vmem:[#allocation2] sm:$0xff]  ;;  %vm63_vm1 = vcmask 244736   ;;  %s550_s9 = smov 108   ;;  %vm107_vm2 = vcmask 130048   ;;  %vm141_vm3 = vcmask 80896  }
   0xe   :  { %v54_v4 = vld [vmem:[%s686_s0 + $0x8] sm:$0xff]  ;;  %v53_v5 = vld [vmem:[%s686_s0] sm:$0xff]  ;;  %s551_s0 = smov 118   ;;  %v552_v33 = vmov 1   ;;  %s557_s13 = smov 88  }
   0xf   :  { %417 = vmatpush.msra.mxu2 %v57_v1  ;;  %87 = vmatpush.msra.mxu0 %v57_v1  ;;  %v443_v6 = vld [vmem:[%s688_s2] ss:$0 sm:$0xff]  ;;  %v98_v13 = vld [vmem:[#allocation5 + $0x8] sm:$0xff]  ;;  %s558_s14 = smov [#allocation7]   ;;  %s397_s18 = sshll.u32 %s691_s5, 4  ;;  %s398_s18 = int_to_ptr.hbm [resolvable:$true] %s397_s18 }
  0x10   :  { %v97_v12 = vld [vmem:[#allocation5] sm:$0xff]  ;;  %435 = vset.pattern.permute.xlu1 %v552_v33  ;;  %436 = vset.pattern.permute.xlu2 %v552_v33  ;;  %s395_s15 = sshll.u32 %s558_s14, 4  ;;  %s396_s15 = int_to_ptr.vmem [resolvable:$true] %s395_s15 }
  0x11   :  { %418 = vmatpush.msra.mxu2 %v56_v2  ;;  %88 = vmatpush.msra.mxu0 %v56_v2  ;;  %v640_v63 = vld [vmem:[%s690_s4] sm:$0xff] }
  0x12   :  { %vm206_vm8 = vcmp.ge.f32.partialorder %v640_v63, 0.1 }
  0x13   :  { %419 = vmatpush.msra.mxu2 %v55_v3  ;;  %89 = vmatpush.msra.mxu0 %v55_v3 }
  0x14   :  { %413 = vmatmul.msk.f32.vlgmr.msra.gmra.mxu2 %vm63_vm1, %v54_v4  ;;  %412 = vmatmul.msk.f32.vlgmr.msra.gmra.mxu0 %vm63_vm1, %v53_v5 }
  0x91   :  { %v91_v9 = vpop.f32.mrf.mxu0 }
  0x92   :  { %v613_v10 = vadd.f32 %v443_v6, %v91_v9 }
  0x97   :  { %v94_v7 = vpop.f32.mrf.mxu2 }
  0x98   :  { %v610_v8 = vadd.f32 %v443_v6, %v94_v7 }
  0x9a   :  { %103 = vrot.lane.b32.xlu0 %v610_v8, %s550_s9 }
  0xa2   :  { %101 = vrot.lane.b32.xlu0 %v613_v10, %s550_s9 }
 0x10c   :  { %v104_v11 = vpop.permute.xlu0 %103 }
 0x10d   :  { %128 = vmatpush.msra.mxu1 %v104_v11  ;;  %420 = vmatpush.msra.mxu3 %v104_v11  ;;  %v140_v17 = vmul.f32 %v104_v11, %v610_v8  ;;  %v553_v11 = vmov 3  }
 0x10e   :  { %437 = vset.pattern.permute.xlu0 %v553_v11 }
 0x10f   :  { %v145_v18 = vsel %vm141_vm3, %v140_v17, 0.0 }
 0x114   :  { %v102_v14 = vpop.permute.xlu0 %101 }
 0x115   :  { %129 = vmatpush.msra.mxu1 %v102_v14  ;;  %421 = vmatpush.msra.mxu3 %v102_v14  ;;  %v139_v15 = vmul.f32 %v102_v14, %v613_v10 }
 0x116   :  { %414 = vmatmul.msk.f32.vlgmr.msra.gmra.mxu1 %vm107_vm2, %v97_v12  ;;  %415 = vmatmul.msk.f32.vlgmr.msra.gmra.mxu3 %vm107_vm2, %v98_v13 }
 0x117   :  { %252 = vrot.lane.b32.xlu1 %v139_v15, %s551_s0  ;;  %v142_v16 = vsel %vm141_vm3, %v139_v15, 0.0  ;;  %v648_v15 = vld [vmem:[%s690_s4 + $0x8] sm:$0xff]  ;;  %s556_s4 = smov 20  }
 0x118   :  { %143 = vadd.xlane.f32.xlu0 %v142_v16  ;;  %vm207_vm13 = vcmp.ge.f32.partialorder %v648_v15, 0.1 }
 0x11f   :  { %254 = vrot.lane.b32.xlu1 %v140_v17, %s551_s0 }
 0x149   :  { %146 = vadd.xlane.f32.xlu1 %v145_v18 }
 0x189   :  { %v253_v19 = vpop.permute.xlu1 %252 }
 0x18a   :  { %v258_v20 = vsel %vm141_vm3, %v253_v19, 0.0 }
 0x18b   :  { %259 = vadd.xlane.f32.xlu0 %v258_v20  ;;  %v144_v34 = vpop.xlane.xlu0 %143 }
 0x191   :  { %v255_v21 = vpop.permute.xlu1 %254 }
 0x192   :  { %v261_v22 = vsel %vm141_vm3, %v255_v21, 0.0 }
 0x193   :  { %262 = vadd.xlane.f32.xlu1 %v261_v22  ;;  %v622_v23 = vpop.f32.mrf.mxu1 }
 0x194   :  { %v148_v24 = vmul.f32 %v622_v23, %v613_v10 }
 0x196   :  { %266 = vrot.lane.b32.xlu2 %v148_v24, %s551_s0  ;;  %v150_v27 = vsel %vm141_vm3, %v148_v24, 0.0 }
 0x199   :  { %v626_v25 = vpop.f32.mrf.mxu3 }
 0x19a   :  { %v149_v26 = vmul.f32 %v626_v25, %v610_v8 }
 0x19c   :  { %v153_v28 = vsel %vm141_vm3, %v149_v26, 0.0 }
 0x19e   :  { %268 = vrot.lane.b32.xlu2 %v149_v26, %s551_s0 }
 0x1bc   :  { %v147_v41 = vpop.xlane.xlu1 %146 }
 0x1c7   :  { %151 = vadd.xlane.f32.xlu2 %v150_v27 }
 0x1cf   :  { %154 = vadd.xlane.f32.xlu2 %v153_v28 }
 0x1f0   :  { %v267_v29 = vpop.permute.xlu2 %266 }
 0x1f1   :  { %v272_v30 = vsel %vm141_vm3, %v267_v29, 0.0 }
 0x1f2   :  { %273 = vadd.xlane.f32.xlu2 %v272_v30 }
 0x1f8   :  { %v269_v31 = vpop.permute.xlu2 %268 }
 0x1f9   :  { %v275_v32 = vsel %vm141_vm3, %v269_v31, 0.0 }
 0x1fa   :  { %276 = vadd.xlane.f32.xlu0 %v275_v32 }
 0x1fe   :  { %v260_v19 = vpop.xlane.xlu0 %259 }
 0x206   :  { %v263_v31 = vpop.xlane.xlu1 %262 }
 0x23a   :  { %v152_v35 = vpop.xlane.xlu2 %151 }
 0x23b   :  { %v156_v36 = vmax.f32 %v144_v34, %v152_v35 }
 0x23d   :  { %v158_v37 = vsub.f32 %v144_v34, %v156_v36  ;;  %v164_v38 = vsub.f32 %v152_v35, %v156_v36 }
 0x23f   :  { %v160_v39 = vmul.f32 1.442695, %v158_v37  ;;  %v166_v40 = vmul.f32 1.442695, %v164_v38  ;;  %v554_v37 = vmov 0  }
 0x241   :  { %444 = vpow2.f32 %v160_v39 }
 0x242   :  { %446 = vpow2.f32 %v166_v40  ;;  %v155_v42 = vpop.xlane.xlu2 %154 }
 0x243   :  { %v157_v43 = vmax.f32 %v147_v41, %v155_v42 }
 0x245   :  { %v159_v44 = vsub.f32 %v147_v41, %v157_v43  ;;  %v165_v45 = vsub.f32 %v155_v42, %v157_v43 }
 0x247   :  { %v445_v46 = vpop.eup %444  ;;  %v162_v47 = vmul.f32 1.442695, %v159_v44  ;;  %v168_v48 = vmul.f32 1.442695, %v165_v45  ;;  %v555_v45 = vmov 2  }
 0x248   :  { %v447_v49 = vpop.eup %446 }
 0x249   :  { %v170_v50 = vadd.f32 %v447_v49, %v445_v46  ;;  %448 = vpow2.f32 %v162_v47 }
 0x24a   :  { %450 = vpow2.f32 %v168_v48 }
 0x24b   :  { %452 = vrcp.f32 %v170_v50  ;;  %v183_v57 = vand.u32 2147483648, %v170_v50  ;;  %v181_v59 = vand.u32 2147483647, %v170_v50  ;;  %vm177_vm5 = vweird.f32 %v170_v50 }
 0x24d   :  { %v184_v62 = vor.u32 1.1754944e-38, %v183_v57  ;;  %vm182_vm7 = vcmp.eq.f32.partialorder %v181_v59, 8.507059e+37 }
 0x24f   :  { %v634_v51 = vpop.eup %448 }
 0x250   :  { %v451_v52 = vpop.eup %450 }
 0x251   :  { %v453_v53 = vpop.eup %452  ;;  %v171_v54 = vadd.f32 %v451_v52, %v634_v51 }
 0x252   :  { %v173_v55 = vmul.f32 %v453_v53, %v170_v50  ;;  %vm178_vm4 = vweird.f32 %v453_v53 }
 0x253   :  { %454 = vrcp.f32 %v171_v54  ;;  %vm179_vm6 = vmor %vm177_vm5, %vm178_vm4  ;;  %v196_v5 = vand.u32 2147483647, %v171_v54  ;;  %v198_v6 = vand.u32 2147483648, %v171_v54  ;;  %vm192_vm10 = vweird.f32 %v171_v54 }
 0x254   :  { %v174_v56 = vsub.f32 1.0, %v173_v55 }
 0x255   :  { %v199_v14 = vor.u32 1.1754944e-38, %v198_v6  ;;  %vm197_vm12 = vcmp.eq.f32.partialorder %v196_v5, 8.507059e+37 }
 0x256   :  { %v175_v58 = vmul.f32 %v453_v53, %v174_v56 }
 0x258   :  { %v176_v60 = vadd.f32 %v453_v53, %v175_v58 }
 0x259   :  { %v455_v61 = vpop.eup %454 }
 0x25a   :  { %v180_v0 = vsel %vm179_vm6, %v453_v53, %v176_v60  ;;  %v188_v1 = vmul.f32 %v455_v61, %v171_v54  ;;  %vm193_vm9 = vweird.f32 %v455_v61 }
 0x25b   :  { %v185_v2 = vsel %vm182_vm7, %v184_v62, %v180_v0  ;;  %vm194_vm11 = vmor %vm192_vm10, %vm193_vm9  ;;  %vm388_vm7 = vcmask 162816  }
 0x25c   :  { %v204_v3 = vmul.f32 %v447_v49, %v185_v2  ;;  %v189_v4 = vsub.f32 1.0, %v188_v1  ;;  %v202_v28 = vmul.f32 %v445_v46, %v185_v2 }
 0x25e   :  { %v212_v7 = vmul.f32 1.1111112, %v204_v3  ;;  %v190_v9 = vmul.f32 %v455_v61, %v189_v4  ;;  %v208_v33 = vmul.f32 1.1111112, %v202_v28 }
 0x260   :  { %v214_v12 = vsel %vm206_vm8, %v212_v7, 0.0  ;;  %v191_v13 = vadd.f32 %v455_v61, %v190_v9  ;;  %v210_v38 = vsel %vm206_vm8, %v208_v33, 0.0 }
 0x261   :  { %230 = vperm.xlu1 %435, %v214_v12  }
 0x262   :  { %v195_v16 = vsel %vm194_vm11, %v455_v61, %v191_v13 }
 0x263   :  { %v650_v17 = vsel %vm197_vm12, %v199_v14, %v195_v16 }
 0x264   :  { %v205_v18 = vmul.f32 %v451_v52, %v650_v17 }
 0x265   :  { %v274_v20 = vpop.xlane.xlu2 %273 }
 0x266   :  { %v278_v21 = vmax.f32 %v260_v19, %v274_v20  ;;  %v213_v22 = vmul.f32 1.1111112, %v205_v18 }
 0x268   :  { %v280_v24 = vsub.f32 %v260_v19, %v278_v21  ;;  %v286_v26 = vsub.f32 %v274_v20, %v278_v21  ;;  %v215_v27 = vsel %vm207_vm13, %v213_v22, 0.0  ;;  %v203_v19 = vmul.f32 %v634_v51, %v650_v17 }
 0x269   :  { %235 = vperm.xlu2 %436, %v215_v27   ;;  %438 = vset.pattern.permute.xlu1 %v553_v11 }
 0x26a   :  { %v282_v29 = vmul.f32 1.442695, %v280_v24  ;;  %v288_v30 = vmul.f32 1.442695, %v286_v26  ;;  %v209_v63 = vmul.f32 1.1111112, %v203_v19 }
 0x26c   :  { %456 = vpow2.f32 %v282_v29  ;;  %v211_v20 = vsel %vm207_vm13, %v209_v63, 0.0 }
 0x26d   :  { %458 = vpow2.f32 %v288_v30  ;;  %v277_v32 = vpop.xlane.xlu0 %276 }
 0x26e   :  { %v279_v34 = vmax.f32 %v263_v31, %v277_v32 }
 0x270   :  { %v281_v35 = vsub.f32 %v263_v31, %v279_v34  ;;  %v287_v36 = vsub.f32 %v277_v32, %v279_v34 }
 0x271   :  { %439 = vset.pattern.permute.xlu2 %v554_v37 }
 0x272   :  { %v457_v39 = vpop.eup %456  ;;  %v284_v40 = vmul.f32 1.442695, %v281_v35  ;;  %v290_v41 = vmul.f32 1.442695, %v287_v36  ;;  %218 = vperm.xlu2 %439, %v210_v38  }
 0x273   :  { %v459_v42 = vpop.eup %458 }
 0x274   :  { %v292_v43 = vadd.f32 %v459_v42, %v457_v39  ;;  %460 = vpow2.f32 %v284_v40 }
 0x275   :  { %462 = vpow2.f32 %v290_v41 }
 0x276   :  { %464 = vrcp.f32 %v292_v43  ;;  %v305_v52 = vand.u32 2147483648, %v292_v43  ;;  %v303_v54 = vand.u32 2147483647, %v292_v43  ;;  %vm299_vm15 = vweird.f32 %v292_v43 }
 0x278   :  { %v306_v57 = vor.u32 1.1754944e-38, %v305_v52  ;;  %vm304_vm1 = vcmp.eq.f32.partialorder %v303_v54, 8.507059e+37 }
 0x27a   :  { %v461_v44 = vpop.eup %460  ;;  %441 = vset.pattern.permute.xlu2 %v555_v45 }
 0x27b   :  { %v463_v46 = vpop.eup %462 }
 0x27c   :  { %v465_v47 = vpop.eup %464  ;;  %v293_v48 = vadd.f32 %v463_v46, %v461_v44 }
 0x27d   :  { %v295_v49 = vmul.f32 %v465_v47, %v292_v43  ;;  %vm300_vm14 = vweird.f32 %v465_v47 }
 0x27e   :  { %466 = vrcp.f32 %v293_v48  ;;  %vm301_vm0 = vmor %vm299_vm15, %vm300_vm14  ;;  %v318_v1 = vand.u32 2147483647, %v293_v48  ;;  %v320_v2 = vand.u32 2147483648, %v293_v48  ;;  %vm314_vm4 = vweird.f32 %v293_v48 }
 0x27f   :  { %v296_v50 = vsub.f32 1.0, %v295_v49 }
 0x280   :  { %v321_v11 = vor.u32 1.1754944e-38, %v320_v2  ;;  %vm319_vm6 = vcmp.eq.f32.partialorder %v318_v1, 8.507059e+37 }
 0x281   :  { %v297_v53 = vmul.f32 %v465_v47, %v296_v50 }
 0x283   :  { %v298_v55 = vadd.f32 %v465_v47, %v297_v53 }
 0x284   :  { %v467_v56 = vpop.eup %466 }
 0x285   :  { %v302_v58 = vsel %vm301_vm0, %v465_v47, %v298_v55  ;;  %v310_v59 = vmul.f32 %v467_v56, %v293_v48  ;;  %vm315_vm2 = vweird.f32 %v467_v56 }
 0x286   :  { %v307_v60 = vsel %vm304_vm1, %v306_v57, %v302_v58  ;;  %vm316_vm5 = vmor %vm314_vm4, %vm315_vm2 }
 0x287   :  { %v326_v61 = vmul.f32 %v459_v42, %v307_v60  ;;  %v324_v62 = vmul.f32 %v457_v39, %v307_v60  ;;  %v311_v0 = vsub.f32 1.0, %v310_v59 }
 0x289   :  { %v332_v3 = vmul.f32 1.1111112, %v326_v61  ;;  %v328_v4 = vmul.f32 1.1111112, %v324_v62  ;;  %v312_v5 = vmul.f32 %v467_v56, %v311_v0 }
 0x28b   :  { %v334_v6 = vsel %vm206_vm8, %v332_v3, 0.0  ;;  %v330_v7 = vsel %vm206_vm8, %v328_v4, 0.0  ;;  %v313_v9 = vadd.f32 %v467_v56, %v312_v5 }
 0x28c   :  { %350 = vperm.xlu0 %437, %v334_v6   ;;  %338 = vperm.xlu2 %441, %v330_v7  }
 0x28d   :  { %v317_v12 = vsel %vm316_vm5, %v467_v56, %v313_v9 }
 0x28e   :  { %v322_v13 = vsel %vm319_vm6, %v321_v11, %v317_v12 }
 0x28f   :  { %v327_v14 = vmul.f32 %v463_v46, %v322_v13  ;;  %v325_v21 = vmul.f32 %v461_v44, %v322_v13 }
 0x291   :  { %v333_v16 = vmul.f32 1.1111112, %v327_v14  ;;  %v329_v22 = vmul.f32 1.1111112, %v325_v21 }
 0x293   :  { %v335_v18 = vsel %vm207_vm13, %v333_v16, 0.0  ;;  %v331_v24 = vsel %vm207_vm13, %v329_v22, 0.0 }
 0x294   :  { %355 = vperm.xlu1 %438, %v335_v18  }
 0x29c   :  { %440 = vset.pattern.permute.xlu1 %v554_v37 }
 0x29d   :  { %223 = vperm.xlu1 %440, %v211_v20  }
 0x2a5   :  { %442 = vset.pattern.permute.xlu1 %v555_v45 }
 0x2a6   :  { %343 = vperm.xlu1 %442, %v331_v24  }
 0x2c3   :  { %v236_v26 = vpop.permute.xlu2 %235 }
 0x2c4   :  { %v239_v27 = vmul.f32 %v236_v26, %v626_v25 }
 0x2c6   :  { %244 = vrot.lane.b32.xlu0 %v239_v27, %s556_s4 }
 0x2cc   :  { %v219_v15 = vpop.permute.xlu2 %218 }
 0x2cd   :  { %v226_v33 = vmul.f32 %v219_v15, %v613_v10 }
 0x2d3   :  { %v231_v28 = vpop.permute.xlu1 %230 }
 0x2d4   :  { %v238_v51 = vmul.f32 %v231_v28, %v622_v23 }
 0x2d6   :  { %242 = vrot.lane.b32.xlu2 %v238_v51, %s556_s4 }
 0x2e6   :  { %v339_v32 = vpop.permute.xlu2 %338 }
 0x2e7   :  { %v346_v42 = vmul.f32 %v339_v32, %v613_v10 }
 0x2fe   :  { %v351_v17 = vpop.permute.xlu0 %350 }
 0x2ff   :  { %v358_v29 = vmul.f32 %v351_v17, %v622_v23 }
 0x301   :  { %362 = vrot.lane.b32.xlu1 %v358_v29, %s556_s4 }
 0x306   :  { %v356_v30 = vpop.permute.xlu1 %355 }
 0x307   :  { %v359_v31 = vmul.f32 %v356_v30, %v626_v25 }
 0x309   :  { %364 = vrot.lane.b32.xlu2 %v359_v31, %s556_s4 }
 0x30f   :  { %v224_v36 = vpop.permute.xlu1 %223 }
 0x310   :  { %v227_v37 = vmul.f32 %v224_v36, %v610_v8 }
 0x318   :  { %v344_v23 = vpop.permute.xlu1 %343 }
 0x319   :  { %v347_v40 = vmul.f32 %v344_v23, %v610_v8 }
 0x330   :  { %v243_v34 = vpop.permute.xlu2 %242 }
 0x331   :  { %v248_v35 = vadd.f32 %v243_v34, %v226_v33 }
 0x333   :  { %372 = vrot.lane.b32.xlu0 %v248_v35, %s557_s13 }
 0x338   :  { %v245_v38 = vpop.permute.xlu0 %244 }
 0x339   :  { %v249_v39 = vadd.f32 %v245_v38, %v227_v37 }
 0x33b   :  { %374 = vrot.lane.b32.xlu1 %v249_v39, %s557_s13 }
 0x363   :  { %v365_v41 = vpop.permute.xlu2 %364 }
 0x364   :  { %v369_v25 = vadd.f32 %v365_v41, %v347_v40 }
 0x366   :  { %382 = vrot.lane.b32.xlu0 %v369_v25, %s557_s13 }
 0x373   :  { %v363_v43 = vpop.permute.xlu1 %362 }
 0x374   :  { %v368_v44 = vadd.f32 %v363_v43, %v346_v42 }
 0x376   :  { %380 = vrot.lane.b32.xlu2 %v368_v44, %s557_s13 }
 0x3a5   :  { %v373_v45 = vpop.permute.xlu0 %372 }
 0x3ad   :  { %v375_v8 = vpop.permute.xlu1 %374 }
 0x3d0   :  { %v381_v46 = vpop.permute.xlu2 %380 }
 0x3d1   :  { %v386_v47 = vsel %vm141_vm3, %v373_v45, %v381_v46 }
 0x3d2   :  { %389 = vst.msk [vmem:[#allocation7] sm:$0xff] %vm388_vm7, %v386_v47 }
 0x3d8   :  { %v383_v48 = vpop.permute.xlu0 %382 }
 0x3d9   :  { %v387_v10 = vsel %vm141_vm3, %v375_v8, %v383_v48 }
 0x3da   :  { %390 = vst.msk [vmem:[#allocation7 + $0x8] sm:$0xff] %vm388_vm7, %v387_v10 }
 0x3db   :  { %403 = dma.vmem_to_hbm [thread:$0]  %s396_s15, 256, %s398_s18, [#allocation4], %s547_s26, %s547_s26, %s548_s27  }
 0x3dc   :  { %544 = dma.done.wait [#allocation4], 256  }
 0x3dd   :  { %545 = vsyncadd [#allocation4], 4294967040 }
 0x3de   :  { %408 = vsyncpa [#allocation3], 1 }
 0x3df   :  { %409 = vsyncpa [#allocation6], 1 }
 0x3e0   :  { %410 = vsyncpa [#allocation4], 1 }

</bundles_post_ra>
